<compile_context>
chip_gen: v7x
topology: tpu7x:2x2x1
jax: 0.10.0
libtpu: 0.0.40
codegen_flags: <defaults>
</compile_context>

<pallas_src>
import jax
import jax.numpy as jnp
from jax.experimental import pallas as pl
from jax.experimental.pallas import tpu as pltpu


def _rope_kernel(q_ref, k_ref, cos_ref, sin_ref, q_out_ref, k_out_ref):
    # q_ref/k_ref/cos_ref/sin_ref: (TS, D) tiles (batch dim squeezed).
    #
    # rotate_half(x) * sin == roll(x, D//2, axis=last) * (sign * sin) with
    # sign = [-1]*(D//2) + [+1]*(D//2); the sign is pre-folded into sin_ref.
    # This equivalence only holds because the cache is concat([freqs, freqs])
    # and the shift is exactly D//2 (direction-symmetric) -- asserted in wrapper.
    cos = cos_ref[...].astype(jnp.float32)
    sin_signed = sin_ref[...].astype(jnp.float32)
    half = q_ref.shape[-1] // 2
    lane_axis = len(q_ref.shape) - 1  # pltpu.roll requires a non-negative axis

    def apply(x_ref, o_ref):
        x = x_ref[...].astype(jnp.float32)
        rot = pltpu.roll(x, shift=half, axis=lane_axis)  # XLU, ~free vs VALU concat
        o_ref[...] = (x * cos + rot * sin_signed).astype(o_ref.dtype)

    apply(q_ref, q_out_ref)
    apply(k_ref, k_out_ref)


def _round_up(x, m):
    return ((x + m - 1) // m) * m


def _vmem_config():
    """(tile_budget_bytes, vmem_limit_bytes), derived from the chip."""
    try:
        cap = pltpu.get_tpu_info().vmem_capacity_bytes
    except Exception:  # interpret mode / no TPU info available
        cap = None
    if cap is not None and cap >= 96 * 1024 * 1024:
        # v5e / v6e: 128 MiB physical VMEM -> large seq tiles.
        return 64 * 1024 * 1024, 96 * 1024 * 1024
    # v7x (64 MiB physical) or unknown backend: stay conservative.
    return 24 * 1024 * 1024, 40 * 1024 * 1024


def _choose_seq_tile(S, D, itemsize, tile_budget_bytes):
    """Largest aligned seq tile fitting the VMEM tile budget.

    Alignment follows packed sublane granularity: 8 rows (32-bit), 16 (bf16),
    32 (int8/fp8).  Live buffers per tile row: q/k/q_out/k_out double-buffered
    (8) + cos/sin counted once each (their block is reused across the inner
    batch loop) -> 10.
    """
    gran = 8 * max(1, 4 // max(1, itemsize))
    per_row = 10 * D * itemsize
    max_rows = max(gran, tile_budget_bytes // per_row)
    ts = min(_round_up(S, gran), (max_rows // gran) * gran)
    return max(ts, gran), gran


class RotaryPositionalEmbeddingPallas:
    """JAX/Pallas equivalent of the PyTorch RotaryPositionalEmbedding."""

    def __init__(self, d_model: int, max_seq_len: int = 2048, theta: float = 10000.0):
        assert d_model % 2 == 0, "RoPE requires an even d_model"
        self.d_model = d_model
        self.max_seq_len = max_seq_len
        self.theta = theta
        inv_freq = 1.0 / (theta ** (jnp.arange(0, d_model, 2, dtype=jnp.float32) / d_model))
        t = jnp.arange(max_seq_len, dtype=jnp.float32)
        freqs = jnp.einsum("i,j->ij", t, inv_freq)        # (max_seq_len, d_model//2)
        emb = jnp.concatenate([freqs, freqs], axis=-1)     # (max_seq_len, d_model)
        self.cos_cached = jnp.cos(emb)                     # matches the PyTorch buffer
        self.sin_cached = jnp.sin(emb)                     # matches the PyTorch buffer
        # Fold the rotate_half sign into the sin cache once (valid only because
        # emb = concat([freqs, freqs]) and the roll shift is exactly D//2).
        sign = jnp.concatenate(
            [-jnp.ones((d_model // 2,), jnp.float32),
             jnp.ones((d_model // 2,), jnp.float32)]
        )
        self.sin_signed_cached = self.sin_cached * sign
        self._cs_by_dtype = {}                             # per-dtype memoized caches

    def _cos_sin(self, dtype):
        key = jnp.dtype(dtype)
        if key not in self._cs_by_dtype:
            # cos/sin travel at the activation dtype (halves HBM traffic for bf16);
            # the kernel upcasts to f32 for the arithmetic.
            self._cs_by_dtype[key] = (
                self.cos_cached.astype(key),
                self.sin_signed_cached.astype(key),
            )
        return self._cs_by_dtype[key]

    def __call__(self, q, k, seq_len: int):
        # q, k: (B, S, D) with S == seq_len
        B, S, D = q.shape
        assert S == seq_len and D == self.d_model and k.shape == q.shape
        assert q.dtype == k.dtype
        assert S <= self.max_seq_len
        # Block last dim equals the full array dim, so any D is legal; D that is
        # a multiple of 128 keeps stores unmasked (lane-dense).
        # TODO(synk): for per-head RoPE with head_dim < 128, restructure the caller
        # to a packed lane-dense layout before calling this kernel.

        cos_full, sin_full = self._cos_sin(q.dtype)        # (max_seq_len, D), no per-call slice

        tile_budget, vmem_limit = _vmem_config()
        ts, gran = _choose_seq_tile(S, D, jnp.dtype(q.dtype).itemsize, tile_budget)
        n_s = pl.cdiv(S, ts)

        # Guarantee >=2-way parallelism for v7x's two TensorCores where possible.
        if n_s == 1 and B == 1 and S >= 2 * gran:
            ts = _round_up(pl.cdiv(S, 2), gran)
            n_s = pl.cdiv(S, ts)

        if n_s >= 2 or B == 1:
            # Seq-tile leading, batch innermost: the cos/sin tile stays resident
            # across the batch loop (fetched once per seq tile).
            grid = (n_s, B)
            qk_spec = pl.BlockSpec((None, ts, D), lambda s, b: (b, s, 0))
            cs_spec = pl.BlockSpec((ts, D), lambda s, b: (s, 0))
        else:
            # Short-sequence / decode: one seq tile; lead with batch so the
            # leading "parallel" axis has extent >= 2.
            grid = (B, n_s)
            qk_spec = pl.BlockSpec((None, ts, D), lambda b, s: (b, s, 0))
            cs_spec = pl.BlockSpec((ts, D), lambda b, s: (s, 0))

        grid_spec = pltpu.PrefetchScalarGridSpec(
            num_scalar_prefetch=0,
            grid=grid,
            in_specs=[qk_spec, qk_spec, cs_spec, cs_spec],
            out_specs=[qk_spec, qk_spec],
        )

        out_shape = (
            jax.ShapeDtypeStruct((B, S, D), q.dtype),
            jax.ShapeDtypeStruct((B, S, D), k.dtype),
        )

        return pl.pallas_call(
            _rope_kernel,
            out_shape=out_shape,
            grid_spec=grid_spec,
            input_output_aliases={0: 0, 1: 1},   # rotate q/k in place
            compiler_params=pltpu.CompilerParams(
                dimension_semantics=("parallel", "parallel"),
                vmem_limit_bytes=vmem_limit,
            ),
        )(q, k, cos_full, sin_full)


def _rope_ref(q, k, cos_cached, sin_cached, seq_len):
    """Pure-JAX reference mirroring the PyTorch forward (slice + concat form)."""
    cos = cos_cached[:seq_len, :]
    sin = sin_cached[:seq_len, :]

    def rotate_half(x):
        half = x.shape[-1] // 2
        x1, x2 = x[..., :half], x[..., half:]
        return jnp.concatenate([-x2, x1], axis=-1)

    q_rot = q * cos + rotate_half(q) * sin
    k_rot = k * cos + rotate_half(k) * sin
    return q_rot, k_rot


if __name__ == "__main__":
    B, S, D = 2, 16, 128        # batch, seq_len, d_model (lane-dense D)
    max_seq_len = 64

    key = jax.random.PRNGKey(0)
    kq, kk = jax.random.split(key)
    q = jax.random.normal(kq, (B, S, D), dtype=jnp.float32)
    k = jax.random.normal(kk, (B, S, D), dtype=jnp.float32)

    rope = RotaryPositionalEmbeddingPallas(d_model=D, max_seq_len=max_seq_len)
    q_rot, k_rot = rope(q, k, seq_len=S)
    jax.block_until_ready((q_rot, k_rot))

    q_ref, k_ref = _rope_ref(q, k, rope.cos_cached, rope.sin_cached, S)
    assert jnp.allclose(q_rot, q_ref, atol=1e-5, rtol=1e-5)
    assert jnp.allclose(k_rot, k_ref, atol=1e-5, rtol=1e-5)

    print("KERNEL_OK")
</pallas_src>

<mosaic_0001>
module attributes {stable_mosaic.version = 11 : i64} {
  func.func @_rope_kernel(%arg0: i32, %arg1: i32, %arg2: memref<1x16x128xf32, #tpu.memory_space<vmem>>, %arg3: memref<1x16x128xf32, #tpu.memory_space<vmem>>, %arg4: memref<16x128xf32, #tpu.memory_space<vmem>>, %arg5: memref<16x128xf32, #tpu.memory_space<vmem>>, %arg6: memref<1x16x128xf32, #tpu.memory_space<vmem>>, %arg7: memref<1x16x128xf32, #tpu.memory_space<vmem>>) attributes {dimension_semantics = [#tpu.dimension_semantics<parallel>, #tpu.dimension_semantics<parallel>], iteration_bounds = array<i64: 2, 1>, scalar_prefetch = 0 : i64, scratch_operands = 0 : i64, tpu.core_type = #tpu.core_type<tc>, window_params = [{transform_indices = @transform_0, window_bounds = array<i64: 1, 16, 128>}, {transform_indices = @transform_1, window_bounds = array<i64: 1, 16, 128>}, {transform_indices = @transform_2, window_bounds = array<i64: 16, 128>}, {transform_indices = @transform_3, window_bounds = array<i64: 16, 128>}, {transform_indices = @transform_4, window_bounds = array<i64: 1, 16, 128>}, {transform_indices = @transform_5, window_bounds = array<i64: 1, 16, 128>}]} {
    %c0 = arith.constant 0 : index
    %c0_0 = arith.constant 0 : index
    %0 = vector.load %arg4[%c0, %c0_0] : memref<16x128xf32, #tpu.memory_space<vmem>>, vector<16x128xf32>
    %c0_1 = arith.constant 0 : index
    %c0_2 = arith.constant 0 : index
    %1 = vector.load %arg5[%c0_1, %c0_2] : memref<16x128xf32, #tpu.memory_space<vmem>>, vector<16x128xf32>
    %c0_3 = arith.constant 0 : index
    %c0_4 = arith.constant 0 : index
    %c0_5 = arith.constant 0 : index
    %2 = vector.load %arg2[%c0_3, %c0_4, %c0_5] : memref<1x16x128xf32, #tpu.memory_space<vmem>>, vector<1x16x128xf32>
    %3 = vector.shape_cast %2 : vector<1x16x128xf32> to vector<16x128xf32>
    %c64_i32 = arith.constant 64 : i32
    %4 = tpu.dynamic_rotate %3 by %c64_i32 dim 1 : vector<16x128xf32>, i32 -> vector<16x128xf32>
    %5 = arith.mulf %3, %0 : vector<16x128xf32>
    %6 = arith.mulf %4, %1 : vector<16x128xf32>
    %7 = arith.addf %5, %6 : vector<16x128xf32>
    %c0_6 = arith.constant 0 : index
    %c0_7 = arith.constant 0 : index
    %c0_8 = arith.constant 0 : index
    %8 = vector.load %arg6[%c0_6, %c0_7, %c0_8] : memref<1x16x128xf32, #tpu.memory_space<vmem>>, vector<1x16x128xf32>
    %9 = vector.shape_cast %8 : vector<1x16x128xf32> to vector<16x128xf32>
    %10 = vector.shape_cast %7 : vector<16x128xf32> to vector<1x16x128xf32>
    tpu.vector_store %arg6[%c0_6, %c0_7, %c0_8], %10 {strides = array<i32>} : memref<1x16x128xf32, #tpu.memory_space<vmem>>, vector<1x16x128xf32>,
    %c0_9 = arith.constant 0 : index
    %c0_10 = arith.constant 0 : index
    %c0_11 = arith.constant 0 : index
    %11 = vector.load %arg3[%c0_9, %c0_10, %c0_11] : memref<1x16x128xf32, #tpu.memory_space<vmem>>, vector<1x16x128xf32>
    %12 = vector.shape_cast %11 : vector<1x16x128xf32> to vector<16x128xf32>
    %c64_i32_12 = arith.constant 64 : i32
    %13 = tpu.dynamic_rotate %12 by %c64_i32_12 dim 1 : vector<16x128xf32>, i32 -> vector<16x128xf32>
    %14 = arith.mulf %12, %0 : vector<16x128xf32>
    %15 = arith.mulf %13, %1 : vector<16x128xf32>
    %16 = arith.addf %14, %15 : vector<16x128xf32>
    %c0_13 = arith.constant 0 : index
    %c0_14 = arith.constant 0 : index
    %c0_15 = arith.constant 0 : index
    %17 = vector.load %arg7[%c0_13, %c0_14, %c0_15] : memref<1x16x128xf32, #tpu.memory_space<vmem>>, vector<1x16x128xf32>
    %18 = vector.shape_cast %17 : vector<1x16x128xf32> to vector<16x128xf32>
    %19 = vector.shape_cast %16 : vector<16x128xf32> to vector<1x16x128xf32>
    tpu.vector_store %arg7[%c0_13, %c0_14, %c0_15], %19 {strides = array<i32>} : memref<1x16x128xf32, #tpu.memory_space<vmem>>, vector<1x16x128xf32>,
    return
  }
  func.func @transform_0(%arg0: i32, %arg1: i32) -> (i32, i32, i32) {
    %c0_i32 = arith.constant 0 : i32
    %c0_i32_0 = arith.constant 0 : i32
    return %arg0, %arg1, %c0_i32 : i32, i32, i32
  }
  func.func @transform_1(%arg0: i32, %arg1: i32) -> (i32, i32, i32) {
    %c0_i32 = arith.constant 0 : i32
    %c0_i32_0 = arith.constant 0 : i32
    return %arg0, %arg1, %c0_i32 : i32, i32, i32
  }
  func.func @transform_2(%arg0: i32, %arg1: i32) -> (i32, i32) {
    %c0_i32 = arith.constant 0 : i32
    %c0_i32_0 = arith.constant 0 : i32
    return %arg1, %c0_i32 : i32, i32
  }
  func.func @transform_3(%arg0: i32, %arg1: i32) -> (i32, i32) {
    %c0_i32 = arith.constant 0 : i32
    %c0_i32_0 = arith.constant 0 : i32
    return %arg1, %c0_i32 : i32, i32
  }
  func.func @transform_4(%arg0: i32, %arg1: i32) -> (i32, i32, i32) {
    %c0_i32 = arith.constant 0 : i32
    %c0_i32_0 = arith.constant 0 : i32
    return %arg0, %arg1, %c0_i32 : i32, i32, i32
  }
  func.func @transform_5(%arg0: i32, %arg1: i32) -> (i32, i32, i32) {
    %c0_i32 = arith.constant 0 : i32
    %c0_i32_0 = arith.constant 0 : i32
    return %arg0, %arg1, %c0_i32 : i32, i32, i32
  }
}

</mosaic_0001>

<bundles_post_ra>
// kernel: tpu_custom_call.1
= control target key start
LH: loop header
LB: loop body
LE: loop exit
PB: predicated region body
PF: predicated region fallthrough
CT: control target
= control target key end

     0   :  { %s1225_s0 = inlined_call_operand.hbm [shape: f32[2,16,128], index: 0, kind: input, shape index: {}, may-alias: {0,4}]   ;;  %s1226_s1 = inlined_call_operand.hbm [shape: f32[2,16,128], index: 1, kind: input, shape index: {}, may-alias: {1,5}]   ;;  %s1227_s2 = inlined_call_operand.vmem [shape: f32[64,128], index: 2, kind: input, shape index: {}]   ;;  %s1228_s3 = inlined_call_operand.vmem [shape: f32[64,128], index: 3, kind: input, shape index: {}]   ;;  %s1229_s4 = inlined_call_operand.hbm [shape: f32[2,16,128], index: 4, kind: output, shape index: {0}, may-alias: {0,4}]   ;;  %s1230_s5 = inlined_call_operand.hbm [shape: f32[2,16,128], index: 5, kind: output, shape index: {1}, may-alias: {1,5}]  }
   0x1   :  { %1234 = sst [smem:[#allocation14_spill]] %s1225_s0 }
   0x2   :  { %11 = vsyncpa [#allocation3], 0 }
   0x3   :  { %13 = vsyncpa [#allocation3 + $0x1], 0 }
   0x4   :  { %14 = vsyncpa [#allocation6], 0 }
   0x5   :  { %16 = vsyncpa [#allocation6 + $0x1], 0 }
   0x6   :  { %17 = vsyncpa [#allocation4], 0 }
   0x7   :  { %19 = vsyncpa [#allocation4 + $0x1], 0 }
   0x8   :  { %20 = vsyncpa [#allocation9], 0 }
   0x9   :  { %22 = vsyncpa [#allocation9 + $0x1], 0  ;;  %s940_s18 = smov 0   ;;  %s942_s19 = smov 0  }
   0xa   :  { %s944_s20 = smov 0   ;;  %s946_s21 = smov 0  }
   0xb   :  { %s948_s22 = smov 0   ;;  %s950_s23 = smov 0  }
   0xc LB: > { %s615_s24 = sadd.s32 4294967295, %s899_s23   ;;  %s616_s25 = sadd.s32 4294967294, %s899_s23   ;;  %s899_s23 = sphi %s950_s23, %s28_s23   ;;  %s895_s22 = sphi %s948_s22, %s1252_s22   ;;  %s891_s21 = sphi %s946_s21, %s1251_s21   ;;  %s887_s20 = sphi %s944_s20, %s1250_s20   ;;  %s883_s19 = sphi %s942_s19, %s1249_s19   ;;  %s879_s18 = sphi %s940_s18, %s1248_s18  }
   0xd   : > { %s40_s26 = sadd.s32 1, %s895_s22  ;;  %s49_s27 = sadd.s32 1, %s887_s20 }
   0xe   : > { %p42_p0 = scmp.ge.s32.totalorder %s40_s26, 2  ;;  %p56_p1 = scmp.ne.s32.totalorder %s887_s20, %s883_s19 }
   0xf   : > { %p57_p2 = scmp.eq.s32.totalorder %s899_s23, 0  ;;  %p62_p3 = scmp.ne.s32.totalorder %s883_s19, %s879_s18 }
  0x10   : > { %s1254_s26 = smov (%p42_p0, %s40_s26), 0  ;;  %p63_p5 = scmp.eq.s32.totalorder %s615_s24, 0 }
  0x11   : > { %p981_p4 = por %p57_p2, %p56_p1  ;;  %s44_s29 = ssub.s32 %s895_s22, %s1254_s26 }
  0x12   : > { %p168_p6 = scmp.eq.s32.totalorder %s615_s24, 1  ;;  %p47_p7 = scmp.eq.s32.totalorder %s44_s29, 0 }
  0x13   : > { %p987_p8 = por %p63_p5, %p62_p3  ;;  %p174_p10 = scmp.eq.s32.totalorder %s616_s25, 1 }
  0x14   : > { %p991_p9 = por %p168_p6, %p56_p1  ;;  %p666_p13 = scmp.lt.s32.totalorder %s899_s23, 2 }
  0x15   : > { %s1236_s30 = scalar_select %p987_p8, 1, 0 }
  0x16   : > { %s1237_s6 = scalar_select %p991_p9, 1, 0 }
  0x17   : > { %s996_s7 = scalar_select %p47_p7, %s887_s20, %s49_s27  }
  0x18   : > { %p998_p11 = por %p174_p10, %p62_p3  ;;  %s1005_s9 = sand.u32 1, %s887_s20  }
  0x19   : > { %s621_s10 = sshll.u32 %s1005_s9, 4  ;;  %s640_s11 = sshll.u32 %s895_s22, 8 }
  0x1a   : > { %s1238_s8 = scalar_select %p998_p11, 1, 0 }
  0x1b   : > { %s1239_s0 = sld [smem:[#allocation14_spill]]  ;;  %s244_s15 = scalar_lea.vmem [#allocation2], %s621_s10 }
  0x1c   : > { %s253_s16 = sshll.u32 %s244_s15, 4  ;;  %p1022_p0 = pnand %p666_p13, %p981_p4  ;;  %s1018_s16 = int_to_ptr.vmem [resolvable:$true] %s253_s16 }
  0x1d   : > { %s241_s24 = scalar_lea.sflag [#allocation3], %s1005_s9 }
  0x1e   : > { %p723_p3 = pneg %p1022_p0 }
  0x21   : > { %s1014_s14 = scalar_lea.hbm %s1239_s0, %s640_s11  ;;  %s726_s28 = scalar_lea.hbm %s1239_s0, 512 }
  0x22   : > { %s721_s25 = scalar_lea.hbm %s1014_s14, 256  ;;  %p727_p4 = scmp.lt.u32.totalorder %s1014_s14, %s1239_s0 }
  0x23   : > { %p722_p2 = scmp.ne.s32.totalorder %s1014_s14, %s721_s25  ;;  %p728_p7 = scmp.lt.u32.totalorder %s726_s28, %s721_s25 }
  0x24   : > { %p730_p13 = scmp.lt.u32.totalorder %s721_s25, %s1014_s14 }
  0x25   : > { %p724_p5 = pnand %p723_p3, %p722_p2  ;;  %p729_p10 = por %p728_p7, %p727_p4 }
  0x27   : > { %p725_p6 = pneg %p724_p5  ;;  %p731_p12 = por %p730_p13, %p729_p10 }
  0x29   : > { %p732_p1 = pnand %p731_p12, %p725_p6 }
  0x2b   : > { %735 = shalt.err (!%p732_p1)
}
  0x2c   : > { %s736_s15 = scalar_lea.vmem %s1018_s16, 256  ;;  %s901_s27 = smov [#allocation2]  }
  0x2d   : > { %p737_p2 = scmp.ne.s32.totalorder %s1018_s16, %s736_s15  ;;  %s741_s29 = sshll.u32 %s901_s27, 4  ;;  %s742_s29 = int_to_ptr.vmem [resolvable:$false] %s741_s29 }
  0x2e   : > { %s743_s12 = scalar_lea.vmem %s742_s29, 512  ;;  %p744_p9 = scmp.lt.s32.totalorder %s1018_s16, %s742_s29 }
  0x2f   : > { %p739_p5 = pnand %p737_p2, %p723_p3  ;;  %p745_p4 = scmp.lt.s32.totalorder %s743_s12, %s736_s15 }
  0x31   : > { %p740_p11 = pneg %p739_p5  ;;  %p746_p7 = por %p745_p4, %p744_p9 }
  0x33   : > { %p747_p10 = pnand %p746_p7, %p740_p11 }
  0x35   : > { %750 = shalt.err (!%p747_p10)
}
  0x36   : > { %s1232_s25 = smov 128   ;;  %s903_s28 = smov 8  }
  0x37   : > { %655 = dma.hbm_to_vmem [thread:$0]  (!%p1022_p0), %s1014_s14, 256, %s1018_s16, %s241_s24, %s1232_s25, %s1232_s25, %s903_s28  }
  0x38   : > { %p284_p9 = scmp.lt.s32.totalorder %s899_s23, 3  ;;  %s1064_s27 = scalar_lea.hbm %s1226_s1, %s640_s11 }
  0x39   : > { %p1241_p11 = scmp.ge.s32.totalorder %s899_s23, 1  ;;  %s267_s12 = scalar_lea.vmem [#allocation5], %s621_s10 }
  0x3a   : > { %s276_s0 = sshll.u32 %s267_s12, 4  ;;  %s264_s14 = scalar_lea.sflag [#allocation6], %s1005_s9  ;;  %s1074_s0 = int_to_ptr.vmem [resolvable:$true] %s276_s0 }
  0x3b   : > { %p1068_p12 = pnand %p1241_p11, %p284_p9  ;;  %s751_s16 = scalar_lea.hbm %s1064_s27, 256 }
  0x3c   : > { %p752_p1 = scmp.ne.s32.totalorder %s1064_s27, %s751_s16  ;;  %s756_s13 = scalar_lea.hbm %s1226_s1, 512 }
  0x3d   : > { %p757_p2 = scmp.lt.u32.totalorder %s1064_s27, %s1226_s1  ;;  %p758_p5 = scmp.lt.u32.totalorder %s756_s13, %s751_s16 }
  0x3e   : > { %p754_p6 = pnand %p752_p1, %p723_p3  ;;  %p760_p7 = scmp.lt.u32.totalorder %s751_s16, %s1064_s27 }
  0x3f   : > { %p759_p4 = por %p758_p5, %p757_p2 }
  0x40   : > { %p755_p13 = pneg %p754_p6 }
  0x41   : > { %p761_p10 = por %p760_p7, %p759_p4 }
  0x43   : > { %p762_p9 = pnand %p761_p10, %p755_p13 }
  0x45   : > { %765 = shalt.err (!%p762_p9)
}
  0x46   : > { %s766_s10 = scalar_lea.vmem %s1074_s0, 256  ;;  %s904_s12 = smov [#allocation5]  }
  0x47   : > { %p767_p11 = scmp.ne.s32.totalorder %s1074_s0, %s766_s10  ;;  %s771_s11 = sshll.u32 %s904_s12, 4  ;;  %s772_s11 = int_to_ptr.vmem [resolvable:$false] %s771_s11 }
  0x48   : > { %s773_s25 = scalar_lea.vmem %s772_s11, 512  ;;  %p774_p8 = scmp.lt.s32.totalorder %s1074_s0, %s772_s11 }
  0x49   : > { %p769_p1 = pnand %p767_p11, %p723_p3  ;;  %p775_p2 = scmp.lt.s32.totalorder %s773_s25, %s766_s10 }
  0x4b   : > { %p770_p6 = pneg %p769_p1  ;;  %p776_p5 = por %p775_p2, %p774_p8 }
  0x4d   : > { %p777_p4 = pnand %p776_p5, %p770_p6 }
  0x4f   : > { %780 = shalt.err (!%p777_p4)
}
  0x50   : > { %s1243_s16 = smov 128   ;;  %288 = sbr.rel (%p1068_p12) target bundleno = 253 (0xfd), region = 36 }
  0x51   : > { %658 = dma.hbm_to_vmem [thread:$0]  (!%p1022_p0), %s1064_s27, 256, %s1074_s0, %s264_s14, %s1243_s16, %s1243_s16, %s903_s28  }
  0x52   : > { %s1108_s24 = sand.u32 (!%p1068_p12), 1, %s883_s19   ;;  %p1244_p8 = scmp.ne.s32.totalorder (!%p1068_p12), %s1236_s30, 0 }
  0x53   : > { %s628_s13 = sshll.u32 (!%p1068_p12), %s1108_s24, 4  ;;  %s291_s15 = scalar_lea.sflag (!%p1068_p12), [#allocation3], %s1108_s24 }
  0x54   : > { %s294_s17 = scalar_lea.vmem (!%p1068_p12), [#allocation2], %s628_s13 }
  0x57   : > { %862 = dma.done.wait (%p1244_p8), %s291_s15, 256  }
  0x58   : > { %864 = vsyncadd (%p1244_p8), %s291_s15, 4294967040  ;;  %s300_s0 = scalar_lea.sflag [#allocation6], %s1108_s24  ;;  %s303_s9 = scalar_lea.vmem [#allocation5], %s628_s13 }
  0x59   : > { %866 = dma.done.wait (%p1244_p8), %s300_s0, 256  }
  0x5a   : > { %868 = vsyncadd (%p1244_p8), %s300_s0, 4294967040  ;;  %v384_v0 = vld [vmem:[%s303_s9] sm:$0xff]  ;;  %s905_s28 = smov 64   ;;  %v385_v2 = vld [vmem:[%s303_s9 + $0x8] sm:$0xff]  ;;  %s349_s11 = scalar_lea.vmem [#allocation8], %s628_s13 }
  0x5b   : > { %v370_v1 = vld [vmem:[%s294_s17] sm:$0xff]  ;;  %386 = vrot.lane.b32.xlu1 %v384_v0, %s905_s28  ;;  %v371_v3 = vld [vmem:[%s294_s17 + $0x8] sm:$0xff]  ;;  %s437_s25 = sshll.u32 %s349_s11, 4  ;;  %s342_s16 = scalar_lea.vmem [#allocation7], %s628_s13  ;;  %s1134_s25 = int_to_ptr.vmem [resolvable:$true] %s437_s25 }
  0x5c   : > { %372 = vrot.lane.b32.xlu0 %v370_v1, %s905_s28  ;;  %v366_v4 = vld [vmem:[%s1227_s2] sm:$0xff]  ;;  %v367_v8 = vld [vmem:[%s1227_s2 + $0x8] sm:$0xff]  ;;  %s419_s15 = sshll.u32 %s342_s16, 4  ;;  %s642_s9 = sshll.u32 %s891_s21, 8  ;;  %s1136_s15 = int_to_ptr.vmem [resolvable:$true] %s419_s15 }
  0x5d   : > { %v368_v5 = vld [vmem:[%s1228_s3] sm:$0xff]  ;;  %v390_v6 = vmul.f32 %v384_v0, %v366_v4  ;;  %v376_v7 = vmul.f32 %v370_v1, %v366_v4  ;;  %v369_v13 = vld [vmem:[%s1228_s3 + $0x8] sm:$0xff]  ;;  %v391_v14 = vmul.f32 %v385_v2, %v367_v8  ;;  %v377_v15 = vmul.f32 %v371_v3, %v367_v8  ;;  %s1141_s27 = scalar_lea.hbm %s1229_s4, %s642_s9  ;;  %s1146_s14 = scalar_lea.hbm %s1230_s5, %s642_s9 }
  0x5e   : > { %s399_s10 = scalar_lea.sflag [#allocation4], %s1108_s24  ;;  %s781_s30 = scalar_lea.vmem %s1136_s15, 256 }
  0x5f   : > { %388 = vrot.lane.b32.xlu1 %v385_v2, %s905_s28  ;;  %p782_p0 = scmp.ne.s32.totalorder %s1136_s15, %s781_s30  ;;  %p1245_p3 = scmp.ne.s32.totalorder %s1237_s6, 0 }
  0x60   : > { %374 = vrot.lane.b32.xlu0 %v371_v3, %s905_s28  ;;  %s906_s12 = smov [#allocation7]  }
  0x61   : > { %p783_p12 = pnand %p782_p0, %p1245_p3  ;;  %s785_s17 = sshll.u32 %s906_s12, 4  ;;  %s786_s17 = int_to_ptr.vmem [resolvable:$false] %s785_s17 }
  0x62   : > { %s787_s0 = scalar_lea.vmem %s786_s17, 512  ;;  %p788_p7 = scmp.lt.s32.totalorder %s1136_s15, %s786_s17 }
  0x63   : > { %p784_p13 = pneg %p783_p12  ;;  %p789_p10 = scmp.lt.s32.totalorder %s787_s0, %s781_s30 }
  0x65   : > { %p790_p9 = por %p789_p10, %p788_p7 }
  0x67   : > { %p791_p11 = pnand %p790_p9, %p784_p13 }
  0xcd   : > { %v387_v9 = vpop.permute.xlu1 %386 }
  0xce   : > { %v373_v10 = vpop.permute.xlu0 %372  ;;  %v392_v11 = vmul.f32 %v387_v9, %v368_v5 }
  0xcf   : > { %v378_v12 = vmul.f32 %v373_v10, %v368_v5 }
  0xd0   : > { %v394_v16 = vadd.f32 %v392_v11, %v390_v6 }
  0xd1   : > { %v380_v17 = vadd.f32 %v378_v12, %v376_v7  ;;  %v389_v18 = vpop.permute.xlu1 %388 }
  0xd2   : > { %v375_v19 = vpop.permute.xlu0 %374  ;;  %396 = vst [vmem:[%s349_s11] sm:$0xff] %v394_v16  ;;  %v393_v20 = vmul.f32 %v389_v18, %v369_v13 }
  0xd3   : > { %382 = vst [vmem:[%s342_s16] sm:$0xff] %v380_v17  ;;  %v379_v21 = vmul.f32 %v375_v19, %v369_v13 }
  0xd4   : > { %v395_v22 = vadd.f32 %v393_v20, %v391_v14 }
  0xd5   : > { %v381_v23 = vadd.f32 %v379_v21, %v377_v15 }
  0xd6   : > { %397 = vst [vmem:[%s349_s11 + $0x8] sm:$0xff] %v395_v22 }
  0xd7   : > { %383 = vst [vmem:[%s342_s16 + $0x8] sm:$0xff] %v381_v23 }
  0xd8   : > { %794 = shalt.err (!%p791_p11)
}
  0xd9   : > { %s795_s11 = scalar_lea.hbm %s1141_s27, 256  ;;  %s799_s13 = scalar_lea.hbm %s1229_s4, 512 }
  0xda   : > { %p796_p1 = scmp.ne.s32.totalorder %s1141_s27, %s795_s11  ;;  %p800_p5 = scmp.lt.u32.totalorder %s1141_s27, %s1229_s4 }
  0xdb   : > { %p801_p4 = scmp.lt.u32.totalorder %s799_s13, %s795_s11  ;;  %p803_p0 = scmp.lt.u32.totalorder %s795_s11, %s1141_s27 }
  0xdc   : > { %p797_p6 = pnand %p796_p1, %p1245_p3 }
  0xdd   : > { %p802_p8 = por %p801_p4, %p800_p5 }
  0xde   : > { %p798_p2 = pneg %p797_p6 }
  0xdf   : > { %p804_p12 = por %p803_p0, %p802_p8 }
  0xe1   : > { %p805_p13 = pnand %p804_p12, %p798_p2 }
  0xe3   : > { %808 = shalt.err (!%p805_p13)
}
  0xe4   : > { %s907_s29 = smov 128   ;;  %s908_s30 = smov 8  }
  0xe5   : > { %648 = dma.vmem_to_hbm [thread:$0]  (%p1245_p3), %s1136_s15, 256, %s1141_s27, %s399_s10, %s907_s29, %s907_s29, %s908_s30  }
  0xe6   : > { %s404_s12 = scalar_lea.sflag [#allocation9], %s1108_s24  ;;  %s809_s17 = scalar_lea.vmem %s1134_s25, 256 }
  0xe7   : > { %p810_p7 = scmp.ne.s32.totalorder %s1134_s25, %s809_s17  ;;  %s909_s0 = smov [#allocation8]  }
  0xe8   : > { %s813_s11 = sshll.u32 %s909_s0, 4  ;;  %s814_s11 = int_to_ptr.vmem [resolvable:$false] %s813_s11 }
  0xe9   : > { %p811_p10 = pnand %p810_p7, %p1245_p3  ;;  %s815_s16 = scalar_lea.vmem %s814_s11, 512 }
  0xea   : > { %p816_p11 = scmp.lt.s32.totalorder %s1134_s25, %s814_s11  ;;  %p817_p1 = scmp.lt.s32.totalorder %s815_s16, %s809_s17 }
  0xeb   : > { %p812_p9 = pneg %p811_p10 }
  0xec   : > { %p818_p6 = por %p817_p1, %p816_p11 }
  0xee   : > { %p819_p2 = pnand %p818_p6, %p812_p9 }
  0xf0   : > { %822 = shalt.err (!%p819_p2)
}
  0xf1   : > { %s823_s15 = scalar_lea.hbm %s1146_s14, 256  ;;  %s827_s9 = scalar_lea.hbm %s1230_s5, 512 }
  0xf2   : > { %p824_p5 = scmp.ne.s32.totalorder %s1146_s14, %s823_s15  ;;  %p828_p0 = scmp.lt.u32.totalorder %s1146_s14, %s1230_s5 }
  0xf3   : > { %p829_p12 = scmp.lt.u32.totalorder %s827_s9, %s823_s15  ;;  %p831_p7 = scmp.lt.u32.totalorder %s823_s15, %s1146_s14 }
  0xf4   : > { %p825_p4 = pnand %p824_p5, %p1245_p3 }
  0xf5   : > { %p830_p13 = por %p829_p12, %p828_p0 }
  0xf6   : > { %p826_p8 = pneg %p825_p4 }
  0xf7   : > { %p832_p10 = por %p831_p7, %p830_p13 }
  0xf9   : > { %p833_p9 = pnand %p832_p10, %p826_p8 }
  0xfb   : > { %836 = shalt.err (!%p833_p9)
}
  0xfc   : > { %649 = dma.vmem_to_hbm [thread:$0]  (%p1245_p3), %s1134_s25, 256, %s1146_s14, %s404_s12, %s907_s29, %s907_s29, %s908_s30  }
  0xfd PF: > { %s452_s21 = sand.u32 1, %s879_s18   ;;  %p1246_p11 = scmp.ne.s32.totalorder %s1238_s8, 0 }
  0xfe   : > { %p1247_p1 = scmp.ge.s32.totalorder %s899_s23, 2  ;;  %s453_s17 = scalar_lea.sflag [#allocation4], %s452_s21 }
 0x100   : > { %p660_p6 = pnand %p1247_p1, %p1246_p11 }
 0x102   : > { %870 = dma.done.wait (!%p660_p6), %s453_s17, 256  }
 0x103   : > { %872 = vsyncadd (!%p660_p6), %s453_s17, 4294967040  ;;  %s462_s6 = scalar_lea.sflag [#allocation9], %s452_s21 }
 0x104   : > { %874 = dma.done.wait (!%p660_p6), %s462_s6, 256  }
 0x105   : > { %876 = vsyncadd (!%p660_p6), %s462_s6, 4294967040  ;;  %s28_s23 = sadd.s32 1, %s899_s23   ;;  %s1248_s18 = smov %s883_s19 }
 0x106   : > { %p25_p2 = scmp.ge.s32.totalorder %s28_s23, 4   ;;  %s1249_s19 = smov %s887_s20 }
 0x107   : > { %s1250_s20 = smov %s996_s7  ;;  %s1251_s21 = smov %s895_s22 }
 0x108   : > { %s1252_s22 = smov %s1254_s26  ;;  %27 = sbr.rel (!%p25_p2) target bundleno = 12 (0xc), region = 117 }
 0x10f   :  { %467 = vsyncpa [#allocation3], 1 }
 0x110   :  { %469 = vsyncpa [#allocation3 + $0x1], 1 }
 0x111   :  { %470 = vsyncpa [#allocation6], 1 }
 0x112   :  { %472 = vsyncpa [#allocation6 + $0x1], 1 }
 0x113   :  { %473 = vsyncpa [#allocation4], 1 }
 0x114   :  { %475 = vsyncpa [#allocation4 + $0x1], 1 }
 0x115   :  { %476 = vsyncpa [#allocation9], 1 }
 0x116   :  { %478 = vsyncpa [#allocation9 + $0x1], 1 }

</bundles_post_ra>
